<compile_context>
chip_gen: v6e
topology: v6e:2x2x1
jax: 0.10.0
libtpu: 0.0.40
codegen_flags: <defaults>
</compile_context>

<pallas_src>
import jax
import jax.numpy as jnp
from jax.experimental import pallas as pl
from jax.experimental.pallas import tpu as pltpu


def value_head_kernel(scalars_ref, x_ref, w1_ref, fc_pack_ref, out_ref):
    # scalars_ref (SMEM, (C+2,))       : [folded conv w_0..w_{C-1}, folded conv+BN bias, fc2 bias]
    # x_ref       (VMEM, (C, HW, TN))  : f32, batch on lanes, spatial on sublanes
    # w1_ref      (VMEM, (HID, HW))    : bf16 fc1 weight, native torch layout (resident)
    # fc_pack_ref (VMEM, (HID, 2))     : f32, col 0 = fc1 bias, col 1 = fc2 weight (resident)
    # out_ref     (VMEM, (1, TN))      : f32 lane-dense value row for this batch tile
    C = x_ref.shape[0]

    # (1) 1x1 conv with BatchNorm(eval) folded in: unrolled C-channel scalar MAC on the
    #     VPU (f32), bias, ReLU. x_ref[c] is a cheap leading-axis view (no sublane gather).
    y = scalars_ref[0] * x_ref[0]
    for c in range(1, C):
        y = y + scalars_ref[c] * x_ref[c]
    y = jnp.maximum(y + scalars_ref[C], 0.0)                        # (HW, TN) f32

    # (2) fc1 for the whole batch tile in ONE plain-NN MXU matmul: bf16 operands,
    #     f32 accumulate. K=HW is lane-major on the LHS and sublane-major on the RHS,
    #     the MXU's natural layout -> no relayout/transpose in the kernel.
    h = jnp.dot(w1_ref[...], y.astype(jnp.bfloat16),
                preferred_element_type=jnp.float32)                 # (HID, TN) f32
    h = jnp.maximum(h + fc_pack_ref[:, 0:1], 0.0)

    # (3) fc2 has a single output unit -> VPU multiply + sublane reduce (no M=1 MXU
    #     round trip); bias + tanh on the EUP. Result is already lane-dense (1, TN).
    v = jnp.sum(h * fc_pack_ref[:, 1:2], axis=0, keepdims=True)     # (1, TN)
    out_ref[...] = jnp.tanh(v + scalars_ref[C + 1])


def value_head(x_nchw, params, *, eps=1e-5, batch_tile=128):
    """x_nchw: (N, C, H, W) float32. Returns (N, 1) float32 (BN in eval mode)."""
    N, C, H, W = x_nchw.shape
    HW = H * W
    F_ = params["conv_w"].shape[0]
    HID = params["fc1_w"].shape[0]
    assert F_ == 1, "canonical value head: VALUE_FILTERS == 1"
    assert params["fc1_w"].shape[1] == F_ * HW

    # ---- host-side parameter prep (one-off, outside the kernel) ----
    # Fold BN (eval, running stats) into the 1x1 conv weight & bias.
    s = params["bn_gamma"][0] * jax.lax.rsqrt(params["bn_var"][0] + eps)
    wfold = s * params["conv_w"].reshape(C)                                         # (C,)
    bfold = s * (params["conv_b"][0] - params["bn_mean"][0]) + params["bn_beta"][0]
    scalars = jnp.concatenate(
        [wfold, jnp.stack([bfold, params["fc2_b"][0]])]).astype(jnp.float32)        # (C+2,)

    # fc1 weight in its native (HID, HW) layout, cast to bf16 (halves its DMA,
    # MXU-native on all generations); fc1 bias / fc2 weight as columns so they
    # broadcast across the lane (batch) axis.
    w1 = params["fc1_w"].astype(jnp.bfloat16)                                       # (HID, HW)
    fc_pack = jnp.stack(
        [params["fc1_b"], params["fc2_w"][0]], axis=1).astype(jnp.float32)          # (HID, 2)

    # ---- batch tiling: batch on lanes, 128-wide tiles, parallel grid (2 TCs on v7x) ----
    if N <= batch_tile:
        TN, Npad = N, N                      # single grid step, block == full array
    else:
        TN = batch_tile
        Npad = pl.cdiv(N, TN) * TN

    # Host layout fix: (N, C, H, W) -> (C, HW, Npad). Channel becomes a cheap leading
    # axis, spatial fills sublanes densely (HW % 8 == 0), batch fills lanes.
    x = x_nchw.reshape(N, C, HW).astype(jnp.float32).transpose(1, 2, 0)             # (C, HW, N)
    if Npad != N:
        x = jnp.pad(x, ((0, 0), (0, 0), (0, Npad - N)))

    out_row = pl.pallas_call(
        value_head_kernel,
        out_shape=jax.ShapeDtypeStruct((1, Npad), jnp.float32),
        grid=(Npad // TN,),
        in_specs=[
            pl.BlockSpec(memory_space=pltpu.MemorySpace.SMEM),        # packed scalars
            pl.BlockSpec((C, HW, TN), lambda i: (0, 0, i)),           # x batch tile
            pl.BlockSpec((HID, HW), lambda i: (0, 0)),                # fc1 weight (resident)
            pl.BlockSpec((HID, 2), lambda i: (0, 0)),                 # fc1 bias / fc2 weight
        ],
        out_specs=pl.BlockSpec((1, TN), lambda i: (0, i)),            # lane-dense values
        compiler_params=pltpu.CompilerParams(dimension_semantics=("parallel",)),
    )(scalars, x, w1, fc_pack)

    return out_row[0, :N].reshape(N, 1)


def reference(x_nchw, params, *, eps=1e-5):
    """Pure-JAX f32 reference replicating the PyTorch forward (BN eval mode)."""
    N, C, H, W = x_nchw.shape
    wconv = params["conv_w"].reshape(-1, C)                   # (F, C), 1x1 conv
    y = jnp.einsum("fc,nchw->nfhw", wconv, x_nchw) + params["conv_b"][None, :, None, None]
    s = params["bn_gamma"] / jnp.sqrt(params["bn_var"] + eps)
    y = (y - params["bn_mean"][None, :, None, None]) * s[None, :, None, None] \
        + params["bn_beta"][None, :, None, None]
    y = jax.nn.relu(y)
    y = y.reshape(N, -1)
    y = jax.nn.relu(y @ params["fc1_w"].T + params["fc1_b"])
    y = y @ params["fc2_w"].T + params["fc2_b"]
    return jnp.tanh(y)


if __name__ == "__main__":
    # config
    N, RESIDUAL_FILTERS, BOARD_SIZE = 2, 4, 16
    VALUE_FILTERS, HIDDEN = 1, 32
    C, H, W = RESIDUAL_FILTERS, BOARD_SIZE, BOARD_SIZE

    key = jax.random.PRNGKey(0)
    ks = jax.random.split(key, 10)
    params = {
        "conv_w":  0.1 * jax.random.normal(ks[0], (VALUE_FILTERS, C, 1, 1), jnp.float32),
        "conv_b":  0.1 * jax.random.normal(ks[1], (VALUE_FILTERS,), jnp.float32),
        "bn_gamma": 1.0 + 0.1 * jax.random.normal(ks[2], (VALUE_FILTERS,), jnp.float32),
        "bn_beta": 0.1 * jax.random.normal(ks[3], (VALUE_FILTERS,), jnp.float32),
        "bn_mean": 0.05 * jax.random.normal(ks[4], (VALUE_FILTERS,), jnp.float32),
        "bn_var":  1.0 + 0.1 * jnp.abs(jax.random.normal(ks[5], (VALUE_FILTERS,), jnp.float32)),
        "fc1_w":   0.05 * jax.random.normal(ks[6], (HIDDEN, BOARD_SIZE ** 2), jnp.float32),
        "fc1_b":   0.05 * jax.random.normal(ks[7], (HIDDEN,), jnp.float32),
        "fc2_w":   0.1 * jax.random.normal(ks[8], (1, HIDDEN), jnp.float32),
        "fc2_b":   0.1 * jax.random.normal(ks[9], (1,), jnp.float32),
    }

    x = jax.random.normal(jax.random.PRNGKey(42), (N, C, H, W), jnp.float32)

    out = jax.block_until_ready(value_head(x, params))
    ref = jax.block_until_ready(reference(x, params))

    assert out.shape == (N, 1), out.shape
    # Tolerance reflects bf16 MXU operands for fc1 (f32 accumulate); reference is full f32.
    assert jnp.allclose(out, ref, atol=1e-2, rtol=1e-2), (out, ref)
    print("KERNEL_OK")
</pallas_src>

<mosaic_0001>
module attributes {stable_mosaic.version = 11 : i64} {
  func.func @value_head_kernel(%arg0: i32, %arg1: memref<6xf32, #tpu.memory_space<smem>>, %arg2: memref<4x256x2xf32, #tpu.memory_space<vmem>>, %arg3: memref<32x256xbf16, #tpu.memory_space<vmem>>, %arg4: memref<32x2xf32, #tpu.memory_space<vmem>>, %arg5: memref<1x2xf32, #tpu.memory_space<vmem>>) attributes {dimension_semantics = [#tpu.dimension_semantics<parallel>], iteration_bounds = array<i64: 1>, scalar_prefetch = 0 : i64, scratch_operands = 0 : i64, tpu.core_type = #tpu.core_type<tc>, window_params = [{transform_indices = @transform_0, window_bounds = array<i64: 6>}, {transform_indices = @transform_1, window_bounds = array<i64: 4, 256, 2>}, {pipeline_mode = #tpu.pipeline_mode<synchronous>, transform_indices = @transform_2, window_bounds = array<i64: 32, 256>}, {pipeline_mode = #tpu.pipeline_mode<synchronous>, transform_indices = @transform_3, window_bounds = array<i64: 32, 2>}, {transform_indices = @transform_4, window_bounds = array<i64: 1, 2>}]} {
    %c0 = arith.constant 0 : index
    %0 = memref.load %arg1[%c0] : memref<6xf32, #tpu.memory_space<smem>>
    %c0_0 = arith.constant 0 : index
    %c0_1 = arith.constant 0 : index
    %c0_2 = arith.constant 0 : index
    %1 = vector.load %arg2[%c0_0, %c0_1, %c0_2] : memref<4x256x2xf32, #tpu.memory_space<vmem>>, vector<1x256x2xf32>
    %2 = vector.shape_cast %1 : vector<1x256x2xf32> to vector<256x2xf32>
    %3 = vector.broadcast %0 : f32 to vector<256x2xf32>
    %4 = arith.mulf %3, %2 : vector<256x2xf32>
    %c1 = arith.constant 1 : index
    %5 = memref.load %arg1[%c1] : memref<6xf32, #tpu.memory_space<smem>>
    %c1_3 = arith.constant 1 : index
    %c0_4 = arith.constant 0 : index
    %c0_5 = arith.constant 0 : index
    %6 = vector.load %arg2[%c1_3, %c0_4, %c0_5] : memref<4x256x2xf32, #tpu.memory_space<vmem>>, vector<1x256x2xf32>
    %7 = vector.shape_cast %6 : vector<1x256x2xf32> to vector<256x2xf32>
    %8 = vector.broadcast %5 : f32 to vector<256x2xf32>
    %9 = arith.mulf %8, %7 : vector<256x2xf32>
    %10 = arith.addf %4, %9 : vector<256x2xf32>
    %c2 = arith.constant 2 : index
    %11 = memref.load %arg1[%c2] : memref<6xf32, #tpu.memory_space<smem>>
    %c2_6 = arith.constant 2 : index
    %c0_7 = arith.constant 0 : index
    %c0_8 = arith.constant 0 : index
    %12 = vector.load %arg2[%c2_6, %c0_7, %c0_8] : memref<4x256x2xf32, #tpu.memory_space<vmem>>, vector<1x256x2xf32>
    %13 = vector.shape_cast %12 : vector<1x256x2xf32> to vector<256x2xf32>
    %14 = vector.broadcast %11 : f32 to vector<256x2xf32>
    %15 = arith.mulf %14, %13 : vector<256x2xf32>
    %16 = arith.addf %10, %15 : vector<256x2xf32>
    %c3 = arith.constant 3 : index
    %17 = memref.load %arg1[%c3] : memref<6xf32, #tpu.memory_space<smem>>
    %c3_9 = arith.constant 3 : index
    %c0_10 = arith.constant 0 : index
    %c0_11 = arith.constant 0 : index
    %18 = vector.load %arg2[%c3_9, %c0_10, %c0_11] : memref<4x256x2xf32, #tpu.memory_space<vmem>>, vector<1x256x2xf32>
    %19 = vector.shape_cast %18 : vector<1x256x2xf32> to vector<256x2xf32>
    %20 = vector.broadcast %17 : f32 to vector<256x2xf32>
    %21 = arith.mulf %20, %19 : vector<256x2xf32>
    %22 = arith.addf %16, %21 : vector<256x2xf32>
    %c4 = arith.constant 4 : index
    %23 = memref.load %arg1[%c4] : memref<6xf32, #tpu.memory_space<smem>>
    %24 = vector.broadcast %23 : f32 to vector<256x2xf32>
    %25 = arith.addf %22, %24 : vector<256x2xf32>
    %cst = arith.constant 0.000000e+00 : f32
    %26 = vector.broadcast %cst : f32 to vector<256x2xf32>
    %27 = arith.maximumf %25, %26 : vector<256x2xf32>
    %c0_12 = arith.constant 0 : index
    %c0_13 = arith.constant 0 : index
    %28 = vector.load %arg3[%c0_12, %c0_13] : memref<32x256xbf16, #tpu.memory_space<vmem>>, vector<32x256xbf16>
    %29 = arith.truncf %27 : vector<256x2xf32> to vector<256x2xbf16>
    %cst_14 = arith.constant dense<0.000000e+00> : vector<32x2xf32>
    %30 = tpu.matmul %28, %29, %cst_14 {dimension_numbers = #tpu.dot_dimension_numbers<[1], [0], [0], [1], [0, 0, 1, 1], [], []>} : vector<32x256xbf16>, vector<256x2xbf16>, vector<32x2xf32> -> vector<32x2xf32>
    %c0_15 = arith.constant 0 : index
    %c0_16 = arith.constant 0 : index
    %31 = vector.load %arg4[%c0_15, %c0_16] : memref<32x2xf32, #tpu.memory_space<vmem>>, vector<32x1xf32>
    %32 = vector.broadcast %31 : vector<32x1xf32> to vector<32x2xf32>
    %33 = arith.addf %30, %32 : vector<32x2xf32>
    %cst_17 = arith.constant 0.000000e+00 : f32
    %34 = vector.broadcast %cst_17 : f32 to vector<32x2xf32>
    %35 = arith.maximumf %33, %34 : vector<32x2xf32>
    %c0_18 = arith.constant 0 : index
    %c1_19 = arith.constant 1 : index
    %36 = vector.load %arg4[%c0_18, %c1_19] : memref<32x2xf32, #tpu.memory_space<vmem>>, vector<32x1xf32>
    %37 = vector.broadcast %36 : vector<32x1xf32> to vector<32x2xf32>
    %38 = arith.mulf %35, %37 : vector<32x2xf32>
    %cst_20 = arith.constant dense<0.000000e+00> : vector<2xf32>
    %39 = vector.multi_reduction <add>, %38, %cst_20 [0] : vector<32x2xf32> to vector<2xf32>
    %40 = vector.shape_cast %39 : vector<2xf32> to vector<1x2xf32>
    %c5 = arith.constant 5 : index
    %41 = memref.load %arg1[%c5] : memref<6xf32, #tpu.memory_space<smem>>
    %42 = vector.broadcast %41 : f32 to vector<1x2xf32>
    %43 = arith.addf %40, %42 : vector<1x2xf32>
    %44 = math.tanh %43 : vector<1x2xf32>
    %c0_21 = arith.constant 0 : index
    %c0_22 = arith.constant 0 : index
    %45 = vector.load %arg5[%c0_21, %c0_22] : memref<1x2xf32, #tpu.memory_space<vmem>>, vector<1x2xf32>
    tpu.vector_store %arg5[%c0_21, %c0_22], %44 {strides = array<i32>} : memref<1x2xf32, #tpu.memory_space<vmem>>, vector<1x2xf32>,
    return
  }
  func.func @transform_0(%arg0: i32) -> i32 {
    %c0_i32 = arith.constant 0 : i32
    %c0_i32_0 = arith.constant 0 : i32
    return %c0_i32 : i32
  }
  func.func @transform_1(%arg0: i32) -> (i32, i32, i32) {
    %c0_i32 = arith.constant 0 : i32
    %c0_i32_0 = arith.constant 0 : i32
    %c0_i32_1 = arith.constant 0 : i32
    return %c0_i32, %c0_i32_0, %arg0 : i32, i32, i32
  }
  func.func @transform_2(%arg0: i32) -> (i32, i32) {
    %c0_i32 = arith.constant 0 : i32
    %c0_i32_0 = arith.constant 0 : i32
    %c0_i32_1 = arith.constant 0 : i32
    return %c0_i32, %c0_i32_0 : i32, i32
  }
  func.func @transform_3(%arg0: i32) -> (i32, i32) {
    %c0_i32 = arith.constant 0 : i32
    %c0_i32_0 = arith.constant 0 : i32
    %c0_i32_1 = arith.constant 0 : i32
    return %c0_i32, %c0_i32_0 : i32, i32
  }
  func.func @transform_4(%arg0: i32) -> (i32, i32) {
    %c0_i32 = arith.constant 0 : i32
    %c0_i32_0 = arith.constant 0 : i32
    return %c0_i32, %arg0 : i32, i32
  }
}

</mosaic_0001>

<bundles_post_ra>
// kernel: tpu_custom_call.1
= control target key start
LH: loop header
LB: loop body
LE: loop exit
PB: predicated region body
PF: predicated region fallthrough
CT: control target
= control target key end

     0   :  { %9 = vsyncpa [#allocation4], 0  ;;  %s1462_s0 = inlined_call_operand.vmem [shape: f32[6], index: 0, kind: input, shape index: {}]   ;;  %s1463_s1 = inlined_call_operand.vmem [shape: f32[4,256,2], index: 1, kind: input, shape index: {}]   ;;  %s1464_s2 = inlined_call_operand.vmem [shape: bf16[32,256], index: 2, kind: input, shape index: {}]   ;;  %s1465_s3 = inlined_call_operand.vmem [shape: f32[32,2], index: 3, kind: input, shape index: {}]   ;;  %s1466_s4 = inlined_call_operand.hbm [shape: f32[1,2], index: 4, kind: output, shape index: {}]  }
   0x1   :  { %10 = vsyncpa [#allocation3], 0  ;;  %s17_s17 = sshll.u32 %s1462_s0, 4  ;;  %s18_s17 = int_to_ptr.vmem [resolvable:$true] %s17_s17 }
   0x2   :  { %s798_s18 = scalar_lea.vmem %s18_s17, 16  ;;  %p803_p1 = scmp.lt.s32.totalorder %s18_s17, %s18_s17 }
   0x3   :  { %p799_p0 = scmp.ne.s32.totalorder %s18_s17, %s798_s18  ;;  %p804_p2 = scmp.lt.s32.totalorder %s798_s18, %s798_s18 }
   0x5   :  { %p805_p3 = por %p804_p2, %p803_p1 }
   0x7   :  { %p806_p4 = pnand %p805_p3, %p799_p0 }
   0x9   :  { %809 = shalt.err (!%p806_p4)
}
   0xa   :  { %s834_s19 = smov [#allocation2]  }
   0xb   :  { %20 = dma.vmem_to_smem %s18_s17, 16, %s834_s19, [#allocation4]  }
   0xc   :  { %830 = dma.done.wait [#allocation4], 16  }
   0xd   :  { %831 = vsyncadd [#allocation4], 4294967280 }
   0xe   :  { %30 = sfence }
   0xf   :  { %s32_s20 = sld [smem:[#allocation2]]  ;;  %v835_v0 = vmov 0   ;;  %v63_v1 = vld [vmem:[%s1463_s1 + $0xf0] sm:$0xff]  ;;  %v64_v2 = vld [vmem:[%s1463_s1 + $0xf8] sm:$0xff]  ;;  %v61_v34 = vld [vmem:[%s1463_s1 + $0xe0] sm:$0xff]  ;;  %vm598_vm0 = vcmask 15360  }
  0x10   :  { %s633_s21 = sld [smem:[#allocation2 + $0x1]]  ;;  %787 = vset.pattern.permute.xlu1 %v835_v0  ;;  %786 = vset.pattern.permute.xlu0 %v835_v0  ;;  %v47_v3 = vld [vmem:[%s1463_s1 + $0x70] sm:$0xff]  ;;  %v665_v5 = vld [vmem:[%s1463_s1 + $0x1f8] sm:$0xff]  ;;  %v62_v39 = vld [vmem:[%s1463_s1 + $0xe8] sm:$0xff]  ;;  %s837_s23 = smov [#allocation5]   ;;  %vm616_vm1 = vcmask 8192  }
  0x11   :  { %s666_s22 = sld [smem:[#allocation2 + $0x2]]  ;;  %v664_v4 = vld [vmem:[%s1463_s1 + $0x1f0] sm:$0xff]  ;;  %v48_v6 = vld [vmem:[%s1463_s1 + $0x78] sm:$0xff]  ;;  %v662_v40 = vld [vmem:[%s1463_s1 + $0x1e0] sm:$0xff]  ;;  %s624_s24 = sshll.u32 %s837_s23, 4  ;;  %s625_s24 = int_to_ptr.vmem [resolvable:$true] %s624_s24 }
  0x12   :  { %s699_s0 = sld [smem:[#allocation2 + $0x3]]  ;;  %v697_v8 = vld [vmem:[%s1463_s1 + $0x2f0] sm:$0xff]  ;;  %v698_v9 = vld [vmem:[%s1463_s1 + $0x2f8] sm:$0xff]  ;;  %v663_v45 = vld [vmem:[%s1463_s1 + $0x1e8] sm:$0xff]  ;;  %s814_s25 = scalar_lea.vmem %s625_s24, 32 }
  0x13   :  { %s872_s27 = sld [smem:[#allocation2 + $0x4]]  ;;  %v648_v10 = vld [vmem:[%s1463_s1 + $0x170] sm:$0xff]  ;;  %v731_v15 = vld [vmem:[%s1463_s1 + $0x3f8] sm:$0xff]  ;;  %v695_v46 = vld [vmem:[%s1463_s1 + $0x2e0] sm:$0xff]  ;;  %p815_p6 = scmp.lt.s32.totalorder %s625_s24, %s625_s24 }
  0x14   :  { %v730_v14 = vld [vmem:[%s1463_s1 + $0x3f0] sm:$0xff]  ;;  %v649_v21 = vld [vmem:[%s1463_s1 + $0x178] sm:$0xff]  ;;  %v696_v51 = vld [vmem:[%s1463_s1 + $0x2e8] sm:$0xff] }
  0x15   :  { %v886_v7 = vstv %s32_s20  ;;  %v681_v22 = vld [vmem:[%s1463_s1 + $0x270] sm:$0xff]  ;;  %v682_v27 = vld [vmem:[%s1463_s1 + $0x278] sm:$0xff]  ;;  %v728_v56 = vld [vmem:[%s1463_s1 + $0x3e0] sm:$0xff] }
  0x16   :  { %v96_v11 = vmul.f32 %v886_v7, %v63_v1  ;;  %v97_v12 = vmul.f32 %v886_v7, %v64_v2  ;;  %v899_v13 = vstv %s633_s21  ;;  %v80_v16 = vmul.f32 %v886_v7, %v47_v3  ;;  %v714_v28 = vld [vmem:[%s1463_s1 + $0x370] sm:$0xff]  ;;  %v715_v33 = vld [vmem:[%s1463_s1 + $0x378] sm:$0xff]  ;;  %v729_v61 = vld [vmem:[%s1463_s1 + $0x3e8] sm:$0xff] }
  0x17   :  { %v163_v17 = vmul.f32 %v664_v4, %v899_v13  ;;  %v164_v18 = vmul.f32 %v665_v5, %v899_v13  ;;  %v910_v19 = vstv %s666_s22  ;;  %v81_v20 = vmul.f32 %v886_v7, %v48_v6  ;;  %v45_v2 = vld [vmem:[%s1463_s1 + $0x60] sm:$0xff]  ;;  %s810_s22 = scalar_lea.vmem %s625_s24, 16 }
  0x18   :  { %v262_v23 = vmul.f32 %v697_v8, %v910_v19  ;;  %v263_v24 = vmul.f32 %v698_v9, %v910_v19  ;;  %v921_v25 = vstv %s699_s0  ;;  %v147_v26 = vmul.f32 %v648_v10, %v899_v13  ;;  %v46_v8 = vld [vmem:[%s1463_s1 + $0x68] sm:$0xff]  ;;  %v646_v9 = vld [vmem:[%s1463_s1 + $0x160] sm:$0xff]  ;;  %p811_p5 = scmp.ne.s32.totalorder %s625_s24, %s810_s22  ;;  %p816_p7 = scmp.lt.s32.totalorder %s814_s25, %s810_s22 }
  0x19   :  { %v195_v29 = vadd.f32 %v163_v17, %v96_v11  ;;  %v196_v30 = vadd.f32 %v164_v18, %v97_v12  ;;  %v361_v31 = vmul.f32 %v730_v14, %v921_v25  ;;  %v362_v32 = vmul.f32 %v731_v15, %v921_v25  ;;  %v647_v15 = vld [vmem:[%s1463_s1 + $0x168] sm:$0xff] }
  0x1a   :  { %v939_v35 = vstv %s872_s27  ;;  %v148_v36 = vmul.f32 %v649_v21, %v899_v13  ;;  %v179_v37 = vadd.f32 %v147_v26, %v80_v16  ;;  %v246_v38 = vmul.f32 %v681_v22, %v910_v19  ;;  %v679_v16 = vld [vmem:[%s1463_s1 + $0x260] sm:$0xff]  ;;  %v680_v22 = vld [vmem:[%s1463_s1 + $0x268] sm:$0xff]  ;;  %p817_p8 = por %p816_p7, %p815_p6 }
  0x1b   :  { %v294_v41 = vadd.f32 %v262_v23, %v195_v29  ;;  %v295_v42 = vadd.f32 %v263_v24, %v196_v30  ;;  %v247_v43 = vmul.f32 %v682_v27, %v910_v19  ;;  %v345_v44 = vmul.f32 %v714_v28, %v921_v25  ;;  %v712_v28 = vld [vmem:[%s1463_s1 + $0x360] sm:$0xff] }
  0x1c   :  { %v180_v47 = vadd.f32 %v148_v36, %v81_v20  ;;  %v278_v48 = vadd.f32 %v246_v38, %v179_v37  ;;  %v346_v49 = vmul.f32 %v715_v33, %v921_v25  ;;  %v94_v50 = vmul.f32 %v886_v7, %v61_v34  ;;  %v713_v33 = vld [vmem:[%s1463_s1 + $0x368] sm:$0xff]  ;;  %v59_v34 = vld [vmem:[%s1463_s1 + $0xd0] sm:$0xff]  ;;  %p818_p9 = pnand %p817_p8, %p811_p5 }
  0x1d   :  { %v393_v52 = vadd.f32 %v361_v31, %v294_v41  ;;  %v394_v53 = vadd.f32 %v362_v32, %v295_v42  ;;  %v95_v54 = vmul.f32 %v886_v7, %v62_v39  ;;  %v161_v55 = vmul.f32 %v662_v40, %v899_v13  ;;  %v60_v39 = vld [vmem:[%s1463_s1 + $0xd8] sm:$0xff]  ;;  %v660_v40 = vld [vmem:[%s1463_s1 + $0x1d0] sm:$0xff] }
  0x1e   :  { %v279_v57 = vadd.f32 %v247_v43, %v180_v47  ;;  %v377_v58 = vadd.f32 %v345_v44, %v278_v48  ;;  %v162_v59 = vmul.f32 %v663_v45, %v899_v13  ;;  %v260_v60 = vmul.f32 %v695_v46, %v910_v19  ;;  %v661_v45 = vld [vmem:[%s1463_s1 + $0x1d8] sm:$0xff]  ;;  %v693_v46 = vld [vmem:[%s1463_s1 + $0x2d0] sm:$0xff] }
  0x1f   :  { %v427_v62 = vadd.f32 %v939_v35, %v393_v52  ;;  %v428_v63 = vadd.f32 %v939_v35, %v394_v53  ;;  %v193_v0 = vadd.f32 %v161_v55, %v94_v50  ;;  %v261_v1 = vmul.f32 %v696_v51, %v910_v19  ;;  %v694_v47 = vld [vmem:[%s1463_s1 + $0x2d8] sm:$0xff]  ;;  %v726_v52 = vld [vmem:[%s1463_s1 + $0x3d0] sm:$0xff] }
  0x20   :  { %v378_v3 = vadd.f32 %v346_v49, %v279_v57  ;;  %v411_v4 = vadd.f32 %v939_v35, %v377_v58  ;;  %v194_v5 = vadd.f32 %v162_v59, %v95_v54  ;;  %v359_v6 = vmul.f32 %v728_v56, %v921_v25  ;;  %v727_v57 = vld [vmem:[%s1463_s1 + $0x3d8] sm:$0xff]  ;;  %v43_v58 = vld [vmem:[%s1463_s1 + $0x50] sm:$0xff] }
  0x21   :  { %v459_v10 = vmax.f32 %v427_v62, 0.0  ;;  %v460_v11 = vmax.f32 %v428_v63, 0.0  ;;  %v292_v12 = vadd.f32 %v260_v60, %v193_v0  ;;  %v360_v14 = vmul.f32 %v729_v61, %v921_v25  ;;  %v44_v63 = vld [vmem:[%s1463_s1 + $0x58] sm:$0xff] }
  0x22   :  { %v412_v17 = vadd.f32 %v939_v35, %v378_v3  ;;  %v443_v18 = vmax.f32 %v411_v4, 0.0  ;;  %v293_v20 = vadd.f32 %v261_v1, %v194_v5  ;;  %v78_v21 = vmul.f32 %v886_v7, %v45_v2  ;;  %v644_v4 = vld [vmem:[%s1463_s1 + $0x150] sm:$0xff]  ;;  %v645_v5 = vld [vmem:[%s1463_s1 + $0x158] sm:$0xff] }
  0x23   :  { %v480_v23 = vpack.c.bf16 %v460_v11, %v459_v10  ;;  %v391_v24 = vadd.f32 %v359_v6, %v292_v12  ;;  %v79_v26 = vmul.f32 %v886_v7, %v46_v8  ;;  %v145_v27 = vmul.f32 %v646_v9, %v899_v13  ;;  %v677_v11 = vld [vmem:[%s1463_s1 + $0x250] sm:$0xff]  ;;  %v678_v12 = vld [vmem:[%s1463_s1 + $0x258] sm:$0xff] }
  0x24   :  { %v444_v29 = vmax.f32 %v412_v17, 0.0  ;;  %v392_v30 = vadd.f32 %v360_v14, %v293_v20  ;;  %v146_v31 = vmul.f32 %v647_v15, %v899_v13  ;;  %v244_v32 = vmul.f32 %v679_v16, %v910_v19  ;;  %v710_v17 = vld [vmem:[%s1463_s1 + $0x350] sm:$0xff] }
  0x25   :  { %738 = vmatprep.subr.bf16.mxu0 %v480_v23  ;;  %766 = vmatprep.subr.bf16.mxu1 %v480_v23  ;;  %v425_v36 = vadd.f32 %v939_v35, %v391_v24  ;;  %v177_v37 = vadd.f32 %v145_v27, %v78_v21  ;;  %v245_v38 = vmul.f32 %v680_v22, %v910_v19  ;;  %v711_v23 = vld [vmem:[%s1463_s1 + $0x358] sm:$0xff]  ;;  %v57_v24 = vld [vmem:[%s1463_s1 + $0xc0] sm:$0xff] }
  0x26   :  { %v472_v41 = vpack.c.bf16 %v444_v29, %v443_v18  ;;  %v426_v42 = vadd.f32 %v939_v35, %v392_v30  ;;  %v178_v43 = vadd.f32 %v146_v31, %v79_v26  ;;  %v343_v44 = vmul.f32 %v712_v28, %v921_v25  ;;  %v58_v30 = vld [vmem:[%s1463_s1 + $0xc8] sm:$0xff] }
  0x27   :  { %v457_v48 = vmax.f32 %v425_v36, 0.0  ;;  %v276_v49 = vadd.f32 %v244_v32, %v177_v37  ;;  %v344_v50 = vmul.f32 %v713_v33, %v921_v25  ;;  %v92_v51 = vmul.f32 %v886_v7, %v59_v34  ;;  %v658_v36 = vld [vmem:[%s1463_s1 + $0x1c0] sm:$0xff]  ;;  %v659_v37 = vld [vmem:[%s1463_s1 + $0x1c8] sm:$0xff] }
  0x28   :  { %739 = vmatpush3.bf16.msra.mxu0 %v472_v41  ;;  %774 = vmatpush3.bf16.msra.mxu1 %v472_v41  ;;  %v458_v53 = vmax.f32 %v426_v42, 0.0  ;;  %v277_v54 = vadd.f32 %v245_v38, %v178_v43  ;;  %v93_v55 = vmul.f32 %v886_v7, %v60_v39  ;;  %v159_v56 = vmul.f32 %v660_v40, %v899_v13  ;;  %v691_v38 = vld [vmem:[%s1463_s1 + $0x2c0] sm:$0xff]  ;;  %v692_v43 = vld [vmem:[%s1463_s1 + $0x2c8] sm:$0xff] }
  0x29   :  { %v375_v59 = vadd.f32 %v343_v44, %v276_v49  ;;  %v160_v60 = vmul.f32 %v661_v45, %v899_v13  ;;  %v258_v61 = vmul.f32 %v693_v46, %v910_v19  ;;  %v259_v62 = vmul.f32 %v694_v47, %v910_v19  ;;  %v725_v49 = vld [vmem:[%s1463_s1 + $0x3c8] sm:$0xff] }
  0x2a   :  { %v479_v0 = vpack.c.bf16 %v458_v53, %v457_v48  ;;  %v376_v1 = vadd.f32 %v344_v50, %v277_v54  ;;  %v191_v2 = vadd.f32 %v159_v56, %v92_v51  ;;  %v357_v3 = vmul.f32 %v726_v52, %v921_v25  ;;  %v724_v48 = vld [vmem:[%s1463_s1 + $0x3c0] sm:$0xff] }
  0x2b   :  { %v409_v6 = vadd.f32 %v939_v35, %v375_v59  ;;  %v192_v8 = vadd.f32 %v160_v60, %v93_v55  ;;  %v358_v9 = vmul.f32 %v727_v57, %v921_v25  ;;  %v76_v10 = vmul.f32 %v886_v7, %v43_v58  ;;  %v41_v54 = vld [vmem:[%s1463_s1 + $0x40] sm:$0xff]  ;;  %v42_v59 = vld [vmem:[%s1463_s1 + $0x48] sm:$0xff] }
  0x2c   :  { %740 = vmatprep.subr.bf16.mxu0 %v479_v0  ;;  %767 = vmatprep.subr.bf16.mxu1 %v479_v0  ;;  %v410_v14 = vadd.f32 %v939_v35, %v376_v1  ;;  %v290_v15 = vadd.f32 %v258_v61, %v191_v2  ;;  %v77_v16 = vmul.f32 %v886_v7, %v44_v63  ;;  %v642_v60 = vld [vmem:[%s1463_s1 + $0x140] sm:$0xff]  ;;  %v643_v1 = vld [vmem:[%s1463_s1 + $0x148] sm:$0xff] }
  0x2d   :  { %v441_v18 = vmax.f32 %v409_v6, 0.0  ;;  %v291_v20 = vadd.f32 %v259_v62, %v192_v8  ;;  %v143_v21 = vmul.f32 %v644_v4, %v899_v13  ;;  %v144_v22 = vmul.f32 %v645_v5, %v899_v13  ;;  %v675_v2 = vld [vmem:[%s1463_s1 + $0x240] sm:$0xff]  ;;  %v676_v8 = vld [vmem:[%s1463_s1 + $0x248] sm:$0xff] }
  0x2e   :  { %v442_v26 = vmax.f32 %v410_v14, 0.0  ;;  %v389_v27 = vadd.f32 %v357_v3, %v290_v15  ;;  %v242_v28 = vmul.f32 %v677_v11, %v910_v19  ;;  %v243_v29 = vmul.f32 %v678_v12, %v910_v19  ;;  %v708_v14 = vld [vmem:[%s1463_s1 + $0x340] sm:$0xff]  ;;  %v709_v15 = vld [vmem:[%s1463_s1 + $0x348] sm:$0xff] }
  0x2f   :  { %v390_v31 = vadd.f32 %v358_v9, %v291_v20  ;;  %v175_v32 = vadd.f32 %v143_v21, %v76_v10  ;;  %v176_v33 = vadd.f32 %v144_v22, %v77_v16  ;;  %v341_v34 = vmul.f32 %v710_v17, %v921_v25  ;;  %v55_v21 = vld [vmem:[%s1463_s1 + $0xb0] sm:$0xff] }
  0x30   :  { %v471_v39 = vpack.c.bf16 %v442_v26, %v441_v18  ;;  %v423_v40 = vadd.f32 %v939_v35, %v389_v27  ;;  %v342_v41 = vmul.f32 %v711_v23, %v921_v25  ;;  %v90_v42 = vmul.f32 %v886_v7, %v57_v24  ;;  %v56_v27 = vld [vmem:[%s1463_s1 + $0xb8] sm:$0xff] }
  0x31   :  { %v424_v44 = vadd.f32 %v939_v35, %v390_v31  ;;  %v274_v45 = vadd.f32 %v242_v28, %v175_v32  ;;  %v275_v46 = vadd.f32 %v243_v29, %v176_v33  ;;  %v91_v47 = vmul.f32 %v886_v7, %v58_v30  ;;  %v656_v28 = vld [vmem:[%s1463_s1 + $0x1b0] sm:$0xff]  ;;  %v657_v29 = vld [vmem:[%s1463_s1 + $0x1b8] sm:$0xff] }
  0x32   :  { %741 = vmatpush3.bf16.msra.mxu0 %v471_v39  ;;  %775 = vmatpush3.bf16.msra.mxu1 %v471_v39  ;;  %v455_v50 = vmax.f32 %v423_v40, 0.0  ;;  %v157_v51 = vmul.f32 %v658_v36, %v899_v13  ;;  %v158_v52 = vmul.f32 %v659_v37, %v899_v13  ;;  %v256_v53 = vmul.f32 %v691_v38, %v910_v19  ;;  %v690_v36 = vld [vmem:[%s1463_s1 + $0x2b8] sm:$0xff] }
  0x33   :  { %v456_v55 = vmax.f32 %v424_v44, 0.0  ;;  %v373_v56 = vadd.f32 %v341_v34, %v274_v45  ;;  %v374_v57 = vadd.f32 %v342_v41, %v275_v46  ;;  %v257_v58 = vmul.f32 %v692_v43, %v910_v19  ;;  %v689_v34 = vld [vmem:[%s1463_s1 + $0x2b0] sm:$0xff]  ;;  %v723_v46 = vld [vmem:[%s1463_s1 + $0x3b8] sm:$0xff] }
  0x34   :  { %v189_v61 = vadd.f32 %v157_v51, %v90_v42  ;;  %v190_v62 = vadd.f32 %v158_v52, %v91_v47  ;;  %v355_v63 = vmul.f32 %v724_v48, %v921_v25  ;;  %v356_v0 = vmul.f32 %v725_v49, %v921_v25  ;;  %v722_v41 = vld [vmem:[%s1463_s1 + $0x3b0] sm:$0xff]  ;;  %v792_v42 = vld [vmem:[%s1464_s2 + $0x4] ss:$8 sps:$4 sm:$0xff]  }
  0x35   :  { %v478_v3 = vpack.c.bf16 %v456_v55, %v455_v50  ;;  %v407_v4 = vadd.f32 %v939_v35, %v373_v56  ;;  %v408_v5 = vadd.f32 %v939_v35, %v374_v57  ;;  %v74_v6 = vmul.f32 %v886_v7, %v41_v54  ;;  %v39_v51 = vld [vmem:[%s1463_s1 + $0x30] sm:$0xff]  ;;  %557 = vmatprep.mubr.bf16.mxu0 %v792_v42 }
  0x36   :  { %v288_v9 = vadd.f32 %v256_v53, %v189_v61  ;;  %v289_v10 = vadd.f32 %v257_v58, %v190_v62  ;;  %v75_v11 = vmul.f32 %v886_v7, %v42_v59  ;;  %v141_v12 = vmul.f32 %v642_v60, %v899_v13  ;;  %v795_v52 = vld [vmem:[%s1464_s2 + $0x14] ss:$8 sps:$4 sm:$0xff]   ;;  %v1203_v60 = vld [vmem:[%s1465_s3] sm:$0xff] }
  0x37   :  { %742 = vmatprep.subr.bf16.mxu0 %v478_v3  ;;  %768 = vmatprep.subr.bf16.mxu1 %v478_v3  ;;  %v439_v16 = vmax.f32 %v407_v4, 0.0  ;;  %v440_v17 = vmax.f32 %v408_v5, 0.0  ;;  %v142_v18 = vmul.f32 %v643_v1, %v899_v13  ;;  %v240_v20 = vmul.f32 %v675_v2, %v910_v19  ;;  %v1189_v53 = vld [vmem:[%s1465_s3 + $0x10] sm:$0xff]  ;;  %v40_v58 = vld [vmem:[%s1463_s1 + $0x38] sm:$0xff] }
  0x38   :  { %v387_v22 = vadd.f32 %v355_v63, %v288_v9  ;;  %v388_v23 = vadd.f32 %v356_v0, %v289_v10  ;;  %v173_v24 = vadd.f32 %v141_v12, %v74_v6  ;;  %v241_v26 = vmul.f32 %v676_v8, %v910_v19  ;;  %v640_v59 = vld [vmem:[%s1463_s1 + $0x130] sm:$0xff]  ;;  %497 = vperm.xlu1 %787, %v1189_v53   ;;  %v641_v1 = vld [vmem:[%s1463_s1 + $0x138] sm:$0xff] }
  0x39   :  { %v470_v30 = vpack.c.bf16 %v440_v17, %v439_v16  ;;  %v174_v31 = vadd.f32 %v142_v18, %v75_v11  ;;  %v339_v32 = vmul.f32 %v708_v14, %v921_v25  ;;  %v340_v33 = vmul.f32 %v709_v15, %v921_v25  ;;  %v673_v2 = vld [vmem:[%s1463_s1 + $0x230] sm:$0xff]  ;;  %565 = vmatprep.mubr.bf16.mxu1 %v795_v52  ;;  %v1216_v3 = vld [vmem:[%s1465_s3 + $0x18] sm:$0xff]  ;;  %v482_v17 = vld [vmem:[%s1465_s3 + $0x8] sm:$0xff] }
  0x3a   :  { %v421_v37 = vadd.f32 %v939_v35, %v387_v22  ;;  %v422_v38 = vadd.f32 %v939_v35, %v388_v23  ;;  %v272_v39 = vadd.f32 %v240_v20, %v173_v24  ;;  %v88_v40 = vmul.f32 %v886_v7, %v55_v21  ;;  %v674_v9 = vld [vmem:[%s1463_s1 + $0x238] sm:$0xff]  ;;  %v706_v10 = vld [vmem:[%s1463_s1 + $0x330] sm:$0xff]  ;;  %487 = vperm.xlu0 %786, %v1203_v60   ;;  %v53_v23 = vld [vmem:[%s1463_s1 + $0xa0] sm:$0xff] }
  0x3b   :  { %743 = vmatpush3.bf16.msra.mxu0 %v470_v30  ;;  %776 = vmatpush3.bf16.msra.mxu1 %v470_v30  ;;  %v273_v43 = vadd.f32 %v241_v26, %v174_v31  ;;  %v89_v44 = vmul.f32 %v886_v7, %v56_v27  ;;  %v155_v45 = vmul.f32 %v656_v28, %v899_v13  ;;  %v707_v16 = vld [vmem:[%s1463_s1 + $0x338] sm:$0xff]  ;;  %v54_v24 = vld [vmem:[%s1463_s1 + $0xa8] sm:$0xff]  ;;  %v654_v30 = vld [vmem:[%s1463_s1 + $0x1a0] sm:$0xff] }
  0x3c   :  { %v453_v47 = vmax.f32 %v421_v37, 0.0  ;;  %v454_v48 = vmax.f32 %v422_v38, 0.0  ;;  %v371_v49 = vadd.f32 %v339_v32, %v272_v39  ;;  %v156_v50 = vmul.f32 %v657_v29, %v899_v13  ;;  %502 = vperm.xlu1 %787, %v1216_v3   ;;  %v655_v31 = vld [vmem:[%s1463_s1 + $0x1a8] sm:$0xff]  ;;  %v687_v37 = vld [vmem:[%s1463_s1 + $0x2a0] sm:$0xff] }
  0x3d   :  { %v372_v54 = vadd.f32 %v340_v33, %v273_v43  ;;  %v187_v55 = vadd.f32 %v155_v45, %v88_v40  ;;  %v254_v56 = vmul.f32 %v689_v34, %v910_v19  ;;  %v255_v57 = vmul.f32 %v690_v36, %v910_v19  ;;  %v688_v38 = vld [vmem:[%s1463_s1 + $0x2a8] sm:$0xff]  ;;  %v720_v43 = vld [vmem:[%s1463_s1 + $0x3a0] sm:$0xff] }
  0x3e   :  { %v477_v61 = vpack.c.bf16 %v454_v48, %v453_v47  ;;  %v405_v62 = vadd.f32 %v939_v35, %v371_v49  ;;  %v188_v63 = vadd.f32 %v156_v50, %v89_v44  ;;  %v353_v0 = vmul.f32 %v722_v41, %v921_v25  ;;  %492 = vperm.xlu0 %786, %v482_v17   ;;  %v721_v48 = vld [vmem:[%s1463_s1 + $0x3a8] sm:$0xff]  ;;  %v37_v49 = vld [vmem:[%s1463_s1 + $0x20] sm:$0xff] }
  0x3f   :  { %v406_v4 = vadd.f32 %v939_v35, %v372_v54  ;;  %v286_v5 = vadd.f32 %v254_v56, %v187_v55  ;;  %v354_v6 = vmul.f32 %v723_v46, %v921_v25  ;;  %v72_v8 = vmul.f32 %v886_v7, %v39_v51  ;;  %v38_v55 = vld [vmem:[%s1463_s1 + $0x28] sm:$0xff] }
  0x40   :  { %744 = vmatprep.subr.bf16.mxu0 %v477_v61  ;;  %769 = vmatprep.subr.bf16.mxu1 %v477_v61  ;;  %v437_v11 = vmax.f32 %v405_v62, 0.0  ;;  %v287_v12 = vadd.f32 %v255_v57, %v188_v63  ;;  %v73_v14 = vmul.f32 %v886_v7, %v40_v58  ;;  %v139_v15 = vmul.f32 %v640_v59, %v899_v13  ;;  %v638_v62 = vld [vmem:[%s1463_s1 + $0x120] sm:$0xff]  ;;  %v639_v63 = vld [vmem:[%s1463_s1 + $0x128] sm:$0xff] }
  0x41   :  { %v438_v18 = vmax.f32 %v406_v4, 0.0  ;;  %v385_v20 = vadd.f32 %v353_v0, %v286_v5  ;;  %v140_v21 = vmul.f32 %v641_v1, %v899_v13  ;;  %v238_v22 = vmul.f32 %v673_v2, %v910_v19  ;;  %v671_v0 = vld [vmem:[%s1463_s1 + $0x220] sm:$0xff] }
  0x42   :  { %v386_v26 = vadd.f32 %v354_v6, %v287_v12  ;;  %v171_v27 = vadd.f32 %v139_v15, %v72_v8  ;;  %v239_v28 = vmul.f32 %v674_v9, %v910_v19  ;;  %v337_v29 = vmul.f32 %v706_v10, %v921_v25  ;;  %v672_v6 = vld [vmem:[%s1463_s1 + $0x228] sm:$0xff]  ;;  %v704_v12 = vld [vmem:[%s1463_s1 + $0x320] sm:$0xff] }
  0x43   :  { %v469_v32 = vpack.c.bf16 %v438_v18, %v437_v11  ;;  %v419_v33 = vadd.f32 %v939_v35, %v385_v20  ;;  %v172_v34 = vadd.f32 %v140_v21, %v73_v14  ;;  %v338_v36 = vmul.f32 %v707_v16, %v921_v25  ;;  %v705_v14 = vld [vmem:[%s1463_s1 + $0x328] sm:$0xff]  ;;  %v51_v20 = vld [vmem:[%s1463_s1 + $0x90] sm:$0xff] }
  0x44   :  { %v420_v39 = vadd.f32 %v939_v35, %v386_v26  ;;  %v270_v40 = vadd.f32 %v238_v22, %v171_v27  ;;  %v86_v41 = vmul.f32 %v886_v7, %v53_v23  ;;  %v87_v42 = vmul.f32 %v886_v7, %v54_v24  ;;  %v652_v26 = vld [vmem:[%s1463_s1 + $0x190] sm:$0xff] }
  0x45   :  { %745 = vmatpush3.bf16.msra.mxu0 %v469_v32  ;;  %777 = vmatpush3.bf16.msra.mxu1 %v469_v32  ;;  %v451_v44 = vmax.f32 %v419_v33, 0.0  ;;  %v271_v45 = vadd.f32 %v239_v28, %v172_v34  ;;  %v153_v46 = vmul.f32 %v654_v30, %v899_v13  ;;  %v154_v47 = vmul.f32 %v655_v31, %v899_v13  ;;  %v653_v31 = vld [vmem:[%s1463_s1 + $0x198] sm:$0xff]  ;;  %v685_v32 = vld [vmem:[%s1463_s1 + $0x290] sm:$0xff] }
  0x46   :  { %v452_v50 = vmax.f32 %v420_v39, 0.0  ;;  %v369_v51 = vadd.f32 %v337_v29, %v270_v40  ;;  %v252_v52 = vmul.f32 %v687_v37, %v910_v19  ;;  %v253_v54 = vmul.f32 %v688_v38, %v910_v19  ;;  %v686_v37 = vld [vmem:[%s1463_s1 + $0x298] sm:$0xff] }
  0x47   :  { %v836_v56 = vmov 1   ;;  %v370_v57 = vadd.f32 %v338_v36, %v271_v45  ;;  %v185_v58 = vadd.f32 %v153_v46, %v86_v41  ;;  %v186_v59 = vadd.f32 %v154_v47, %v87_v42  ;;  %v718_v42 = vld [vmem:[%s1463_s1 + $0x390] sm:$0xff] }
  0x48   :  { %789 = vset.pattern.permute.xlu1 %v836_v56  ;;  %v351_v61 = vmul.f32 %v720_v43, %v921_v25  ;;  %v476_v1 = vpack.c.bf16 %v452_v50, %v451_v44  ;;  %v403_v2 = vadd.f32 %v939_v35, %v369_v51  ;;  %v352_v4 = vmul.f32 %v721_v48, %v921_v25  ;;  %v719_v43 = vld [vmem:[%s1463_s1 + $0x398] sm:$0xff]  ;;  %v35_v47 = vld [vmem:[%s1463_s1 + $0x10] sm:$0xff] }
  0x49   :  { %583 = vperm.xlu1 %789, %v482_v17   ;;  %v70_v5 = vmul.f32 %v886_v7, %v37_v49  ;;  %788 = vset.pattern.permute.xlu0 %v836_v56  ;;  %v404_v8 = vadd.f32 %v939_v35, %v370_v57  ;;  %v284_v9 = vadd.f32 %v252_v52, %v185_v58  ;;  %v36_v52 = vld [vmem:[%s1463_s1 + $0x18] sm:$0xff] }
  0x4a   :  { %v285_v10 = vadd.f32 %v253_v54, %v186_v59  ;;  %v71_v11 = vmul.f32 %v886_v7, %v38_v55  ;;  %579 = vperm.xlu0 %788, %v1203_v60   ;;  %746 = vmatprep.subr.bf16.mxu0 %v476_v1  ;;  %v435_v15 = vmax.f32 %v403_v2, 0.0  ;;  %v137_v16 = vmul.f32 %v638_v62, %v899_v13  ;;  %v52_v60 = vld [vmem:[%s1463_s1 + $0x98] sm:$0xff]  ;;  %v636_v54 = vld [vmem:[%s1463_s1 + $0x110] sm:$0xff] }
  0x4b   :  { %770 = vmatprep.subr.bf16.mxu1 %v476_v1  ;;  %v138_v17 = vmul.f32 %v639_v63, %v899_v13  ;;  %v236_v18 = vmul.f32 %v671_v0, %v910_v19  ;;  %v436_v21 = vmax.f32 %v404_v8, 0.0  ;;  %v383_v22 = vadd.f32 %v351_v61, %v284_v9  ;;  %v637_v59 = vld [vmem:[%s1463_s1 + $0x118] sm:$0xff]  ;;  %v669_v1 = vld [vmem:[%s1463_s1 + $0x210] sm:$0xff] }
  0x4c   :  { %v384_v23 = vadd.f32 %v352_v4, %v285_v10  ;;  %v237_v24 = vmul.f32 %v672_v6, %v910_v19  ;;  %v169_v27 = vadd.f32 %v137_v16, %v70_v5  ;;  %v335_v29 = vmul.f32 %v704_v12, %v921_v25  ;;  %v670_v2 = vld [vmem:[%s1463_s1 + $0x218] sm:$0xff]  ;;  %v702_v8 = vld [vmem:[%s1463_s1 + $0x310] sm:$0xff] }
  0x4d   :  { %587 = vperm.xlu1 %789, %v1189_v53   ;;  %v170_v28 = vadd.f32 %v138_v17, %v71_v11  ;;  %v336_v30 = vmul.f32 %v705_v14, %v921_v25  ;;  %v468_v33 = vpack.c.bf16 %v436_v21, %v435_v15  ;;  %v417_v34 = vadd.f32 %v939_v35, %v383_v22  ;;  %v703_v14 = vld [vmem:[%s1463_s1 + $0x318] sm:$0xff]  ;;  %v49_v15 = vld [vmem:[%s1463_s1 + $0x80] sm:$0xff]  ;;  %v50_v21 = vld [vmem:[%s1463_s1 + $0x88] sm:$0xff] }
  0x4e   :  { %v418_v36 = vadd.f32 %v939_v35, %v384_v23  ;;  %v84_v53 = vmul.f32 %v886_v7, %v51_v20  ;;  %591 = vperm.xlu0 %788, %v1216_v3   ;;  %v268_v38 = vadd.f32 %v236_v18, %v169_v27  ;;  %v85_v40 = vmul.f32 %v886_v7, %v52_v60  ;;  %v650_v22 = vld [vmem:[%s1463_s1 + $0x180] sm:$0xff]  ;;  %v651_v27 = vld [vmem:[%s1463_s1 + $0x188] sm:$0xff] }
  0x4f   :  { %v269_v39 = vadd.f32 %v237_v24, %v170_v28  ;;  %v151_v41 = vmul.f32 %v652_v26, %v899_v13  ;;  %747 = vmatpush3.bf16.msra.mxu0 %v468_v33  ;;  %778 = vmatpush3.bf16.msra.mxu1 %v468_v33  ;;  %v449_v44 = vmax.f32 %v417_v34, 0.0  ;;  %v152_v3 = vmul.f32 %v653_v31, %v899_v13  ;;  %v683_v28 = vld [vmem:[%s1463_s1 + $0x280] sm:$0xff]  ;;  %v684_v33 = vld [vmem:[%s1463_s1 + $0x288] sm:$0xff] }
  0x50   :  { %v450_v45 = vmax.f32 %v418_v36, 0.0  ;;  %v250_v46 = vmul.f32 %v685_v32, %v910_v19  ;;  %v367_v48 = vadd.f32 %v335_v29, %v268_v38  ;;  %v251_v51 = vmul.f32 %v686_v37, %v910_v19  ;;  %v716_v34 = vld [vmem:[%s1463_s1 + $0x380] sm:$0xff] }
  0x51   :  { %v368_v49 = vadd.f32 %v336_v30, %v269_v39  ;;  %v183_v50 = vadd.f32 %v151_v41, %v84_v53  ;;  %v184_v56 = vadd.f32 %v152_v3, %v85_v40  ;;  %v349_v57 = vmul.f32 %v718_v42, %v921_v25  ;;  %v717_v39 = vld [vmem:[%s1463_s1 + $0x388] sm:$0xff] }
  0x52   :  { %v475_v55 = vpack.c.bf16 %v450_v45, %v449_v44  ;;  %v350_v58 = vmul.f32 %v719_v43, %v921_v25  ;;  %v401_v61 = vadd.f32 %v939_v35, %v367_v48  ;;  %v68_v0 = vmul.f32 %v886_v7, %v35_v47  ;;  %v33_v44 = vld [vmem:[%s1463_s1] sm:$0xff]  ;;  %v34_v45 = vld [vmem:[%s1463_s1 + $0x8] sm:$0xff] }
  0x53   :  { %v402_v62 = vadd.f32 %v939_v35, %v368_v49  ;;  %v282_v63 = vadd.f32 %v250_v46, %v183_v50  ;;  %v283_v4 = vadd.f32 %v251_v51, %v184_v56  ;;  %v69_v5 = vmul.f32 %v886_v7, %v36_v52  ;;  %v634_v49 = vld [vmem:[%s1463_s1 + $0x100] sm:$0xff]  ;;  %v635_v50 = vld [vmem:[%s1463_s1 + $0x108] sm:$0xff] }
  0x54   :  { %748 = vmatprep.subr.bf16.mxu0 %v475_v55  ;;  %771 = vmatprep.subr.bf16.mxu1 %v475_v55  ;;  %v135_v6 = vmul.f32 %v636_v54, %v899_v13  ;;  %v433_v9 = vmax.f32 %v401_v61, 0.0  ;;  %v136_v12 = vmul.f32 %v637_v59, %v899_v13  ;;  %v234_v18 = vmul.f32 %v669_v1, %v910_v19  ;;  %v667_v56 = vld [vmem:[%s1463_s1 + $0x200] sm:$0xff] }
  0x55   :  { %v434_v10 = vmax.f32 %v402_v62, 0.0  ;;  %v381_v11 = vadd.f32 %v349_v57, %v282_v63  ;;  %v382_v16 = vadd.f32 %v350_v58, %v283_v4  ;;  %v235_v20 = vmul.f32 %v670_v2, %v910_v19  ;;  %v668_v57 = vld [vmem:[%s1463_s1 + $0x208] sm:$0xff]  ;;  %v700_v63 = vld [vmem:[%s1463_s1 + $0x300] sm:$0xff] }
  0x56   :  { %v167_v17 = vadd.f32 %v135_v6, %v68_v0  ;;  %v168_v60 = vadd.f32 %v136_v12, %v69_v5  ;;  %v333_v26 = vmul.f32 %v702_v8, %v921_v25  ;;  %v334_v31 = vmul.f32 %v703_v14, %v921_v25  ;;  %v701_v5 = vld [vmem:[%s1463_s1 + $0x308] sm:$0xff] }
  0x57   :  { %v467_v23 = vpack.c.bf16 %v434_v10, %v433_v9  ;;  %v415_v24 = vadd.f32 %v939_v35, %v381_v11  ;;  %v416_v29 = vadd.f32 %v939_v35, %v382_v16  ;;  %v82_v32 = vmul.f32 %v886_v7, %v49_v15 }
  0x58   :  { %v266_v30 = vadd.f32 %v234_v18, %v167_v17  ;;  %v267_v53 = vadd.f32 %v235_v20, %v168_v60  ;;  %v83_v37 = vmul.f32 %v886_v7, %v50_v21  ;;  %v149_v38 = vmul.f32 %v650_v22, %v899_v13 }
  0x59   :  { %749 = vmatpush3.bf16.msra.mxu0 %v467_v23  ;;  %779 = vmatpush3.bf16.msra.mxu1 %v467_v23  ;;  %v447_v36 = vmax.f32 %v415_v24, 0.0  ;;  %v448_v40 = vmax.f32 %v416_v29, 0.0  ;;  %v150_v42 = vmul.f32 %v651_v27, %v899_v13  ;;  %v248_v43 = vmul.f32 %v683_v28, %v910_v19  ;;  %v790_v29 = vld [vmem:[%s1464_s2] ss:$8 sps:$4 sm:$0xff]  }
  0x5a   :  { %v365_v41 = vadd.f32 %v333_v26, %v266_v30  ;;  %v366_v3 = vadd.f32 %v334_v31, %v267_v53  ;;  %v181_v46 = vadd.f32 %v149_v38, %v82_v32  ;;  %v249_v47 = vmul.f32 %v684_v33, %v910_v19  ;;  %v793_v30 = vld [vmem:[%s1464_s2 + $0x10] ss:$8 sps:$4 sm:$0xff]   ;;  %s737_s2 = sld [smem:[#allocation2 + $0x5]] }
  0x5b   :  { %v347_v48 = vmul.f32 %v716_v34, %v921_v25  ;;  %v474_v51 = vpack.c.bf16 %v448_v40, %v447_v36  ;;  %v182_v54 = vadd.f32 %v150_v42, %v83_v37  ;;  %v348_v55 = vmul.f32 %v717_v39, %v921_v25 }
  0x5c   :  { %v399_v52 = vadd.f32 %v939_v35, %v365_v41  ;;  %v400_v58 = vadd.f32 %v939_v35, %v366_v3  ;;  %v280_v59 = vadd.f32 %v248_v43, %v181_v46  ;;  %v66_v61 = vmul.f32 %v886_v7, %v33_v44 }
  0x5d   :  { %v67_v62 = vmul.f32 %v886_v7, %v34_v45  ;;  %750 = vmatprep.subr.bf16.mxu0 %v474_v51  ;;  %772 = vmatprep.subr.bf16.mxu1 %v474_v51  ;;  %v281_v1 = vadd.f32 %v249_v47, %v182_v54  ;;  %v133_v2 = vmul.f32 %v634_v49, %v899_v13 }
  0x5e   :  { %v431_v0 = vmax.f32 %v399_v52, 0.0  ;;  %v134_v4 = vmul.f32 %v635_v50, %v899_v13  ;;  %v432_v6 = vmax.f32 %v400_v58, 0.0  ;;  %v379_v8 = vadd.f32 %v347_v48, %v280_v59 }
  0x5f   :  { %v232_v7 = vmul.f32 %v667_v56, %v910_v19  ;;  %v233_v9 = vmul.f32 %v668_v57, %v910_v19  ;;  %v380_v10 = vadd.f32 %v348_v55, %v281_v1  ;;  %v165_v11 = vadd.f32 %v133_v2, %v66_v61 }
  0x60   :  { %v166_v12 = vadd.f32 %v134_v4, %v67_v62  ;;  %v331_v14 = vmul.f32 %v700_v63, %v921_v25  ;;  %v466_v15 = vpack.c.bf16 %v432_v6, %v431_v0  ;;  %v413_v16 = vadd.f32 %v939_v35, %v379_v8 }
  0x61   :  { %v332_v13 = vmul.f32 %v701_v5, %v921_v25  ;;  %v414_v17 = vadd.f32 %v939_v35, %v380_v10  ;;  %v264_v18 = vadd.f32 %v232_v7, %v165_v11 }
  0x62   :  { %v265_v20 = vadd.f32 %v233_v9, %v166_v12  ;;  %751 = vmatpush3.bf16.msra.mxu0 %v466_v15  ;;  %780 = vmatpush3.bf16.msra.mxu1 %v466_v15  ;;  %v445_v21 = vmax.f32 %v413_v16, 0.0  ;;  %v613_v12 = vstv %s737_s2 }
  0x63   :  { %v446_v22 = vmax.f32 %v414_v17, 0.0  ;;  %v363_v23 = vadd.f32 %v331_v14, %v264_v18 }
  0x64   :  { %v364_v19 = vadd.f32 %v332_v13, %v265_v20 }
  0x65   :  { %v473_v24 = vpack.c.bf16 %v446_v22, %v445_v21  ;;  %v397_v60 = vadd.f32 %v939_v35, %v363_v23 }
  0x66   :  { %v398_v26 = vadd.f32 %v939_v35, %v364_v19 }
  0x67   :  { %752 = vmatprep.subr.bf16.mxu0 %v473_v24  ;;  %773 = vmatprep.subr.bf16.mxu1 %v473_v24  ;;  %v429_v27 = vmax.f32 %v397_v60, 0.0 }
  0x68   :  { %v430_v28 = vmax.f32 %v398_v26, 0.0 }
  0x6a   :  { %v465_v25 = vpack.c.bf16 %v430_v28, %v429_v27 }
  0x6c   :  { %753 = vmatpush3.bf16.msra.mxu0 %v465_v25  ;;  %781 = vmatpush3.bf16.msra.mxu1 %v465_v25 }
  0x6f   :  { %558 = vmatmul.mubr.bf16.vlgmr.msra.gmra.mxu0 %v790_v29  ;;  %566 = vmatmul.mubr.bf16.vlgmr.msra.gmra.mxu1 %v793_v30 }
  0xb3   :  { %v498_v31 = vpop.permute.xlu1 %497 }
  0xb5   :  { %v488_v32 = vpop.permute.xlu0 %487 }
  0xb7   :  { %v503_v35 = vpop.permute.xlu1 %502 }
  0xb9   :  { %v493_v33 = vpop.permute.xlu0 %492 }
  0xc4   :  { %v584_v40 = vpop.permute.xlu1 %583 }
  0xc5   :  { %v580_v45 = vpop.permute.xlu0 %579 }
  0xc8   :  { %v588_v54 = vpop.permute.xlu1 %587 }
  0xc9   :  { %v592_v58 = vpop.permute.xlu0 %591 }
 0x12f   :  { %v754_v34 = vpop.f32.mrf.mxu0  ;;  %v760_v36 = vpop.f32.mrf.mxu1 }
 0x131   :  { %v755_v53 = vpop.f32.mrf.mxu0  ;;  %v761_v37 = vpop.f32.mrf.mxu1 }
 0x132   :  { %v756_v38 = vadd.f32 %v755_v53, %v754_v34  ;;  %v762_v39 = vadd.f32 %v761_v37, %v760_v36 }
 0x133   :  { %v757_v41 = vpop.f32.mrf.mxu0  ;;  %v763_v42 = vpop.f32.mrf.mxu1 }
 0x134   :  { %v560_v43 = vadd.f32 %v756_v38, %v488_v32  ;;  %v568_v44 = vadd.f32 %v762_v39, %v498_v31 }
 0x135   :  { %v758_v3 = vpop.f32.mrf.mxu0  ;;  %v764_v46 = vpop.f32.mrf.mxu1 }
 0x136   :  { %v759_v47 = vadd.f32 %v758_v3, %v757_v41  ;;  %v765_v48 = vadd.f32 %v764_v46, %v763_v42  ;;  %v574_v49 = vmax.f32 %v560_v43, 0.0  ;;  %v576_v52 = vmax.f32 %v568_v44, 0.0 }
 0x138   :  { %v563_v50 = vadd.f32 %v759_v47, %v493_v33  ;;  %v571_v51 = vadd.f32 %v765_v48, %v503_v35  ;;  %v594_v56 = vmul.f32 %v580_v45, %v574_v49  ;;  %v596_v61 = vmul.f32 %v588_v54, %v576_v52 }
 0x13a   :  { %v575_v55 = vmax.f32 %v563_v50, 0.0  ;;  %v577_v57 = vmax.f32 %v571_v51, 0.0  ;;  %v599_v62 = vsel %vm598_vm0, %v594_v56, 0.0  ;;  %v602_v2 = vsel %vm598_vm0, %v596_v61, 0.0 }
 0x13c   :  { %v595_v59 = vmul.f32 %v584_v40, %v575_v55  ;;  %v597_v0 = vmul.f32 %v592_v58, %v577_v57 }
 0x13e   :  { %v600_v63 = vsel %vm598_vm0, %v595_v59, 0.0  ;;  %v604_v5 = vsel %vm598_vm0, %v597_v0, 0.0 }
 0x13f   :  { %v601_v1 = vadd.f32 %v600_v63, %v599_v62 }
 0x141   :  { %v603_v4 = vadd.f32 %v602_v2, %v601_v1 }
 0x143   :  { %v605_v6 = vadd.f32 %v604_v5, %v603_v4 }
 0x145   :  { %v606_v8 = vrot.slane %v605_v6, 4 }
 0x147   :  { %v607_v7 = vadd.f32 %v606_v8, %v605_v6 }
 0x149   :  { %v608_v9 = vrot.slane %v607_v7, 2 }
 0x14b   :  { %v609_v10 = vadd.f32 %v608_v9, %v607_v7 }
 0x14d   :  { %v610_v11 = vrot.slane %v609_v10, 1 }
 0x14f   :  { %v611_v14 = vadd.f32 %v610_v11, %v609_v10 }
 0x151   :  { %v614_v15 = vadd.f32 %v613_v12, %v611_v14 }
 0x153   :  { %796 = vtanh.f32 %v614_v15 }
 0x160   :  { %v797_v16 = vpop.eup %796 }
 0x161   :  { %617 = vst.msk [vmem:[#allocation5] sm:$0x1] %vm616_vm1, %v797_v16 }
 0x162   :  { %821 = shalt.err (!%p818_p9)
}
 0x163   :  { %627 = dma.vmem_to_hbm [thread:$0]  %s625_s24, 16, %s1466_s4, [#allocation3]  }
 0x164   :  { %832 = dma.done.wait [#allocation3], 16  }
 0x165   :  { %833 = vsyncadd [#allocation3], 4294967280 }
 0x166   :  { %631 = vsyncpa [#allocation3], 1 }
 0x167   :  { %632 = vsyncpa [#allocation4], 1 }

</bundles_post_ra>
